<compile_context>
chip_gen: v5e
topology: v5e:2x2
jax: 0.10.0
libtpu: 0.0.40
codegen_flags: <defaults>
</compile_context>

<pallas_src>
import math
from functools import partial

import numpy as np
import jax
import jax.numpy as jnp
from jax import lax
from jax.experimental import pallas as pl
from jax.experimental.pallas import tpu as pltpu

PBN_EPS = 1e-5                                   # nn.BatchNorm1d default eps
PDBN_EPS = 1e-3                                  # PDBatchNorm eps
PBN_SCALE = 1.0 / math.sqrt(1.0 + PBN_EPS)
PDBN_SCALE = 1.0 / math.sqrt(1.0 + PDBN_EPS)

ACT_DT = jnp.bfloat16                            # activation / weight storage dtype


def _vmem_caps():
    """Generation-aware VMEM: ~96 MiB scoped on 128-MiB chips (v5e/v6e),
    ~48 MiB on 64-MiB chips (v7x); per-kernel tile budget ~= 1/4 of that."""
    phys = 64 * 1024 * 1024
    try:
        info = pltpu.get_tpu_info()
        phys = int(getattr(info, "vmem_capacity_bytes", phys))
    except Exception:
        pass
    limit = min(phys * 3 // 4, 96 * 1024 * 1024)
    return limit, max(limit // 4, 8 * 1024 * 1024)


VMEM_LIMIT, TILE_BUDGET = _vmem_caps()
TARGET_STEP_BYTES = 4 * 1024 * 1024              # 2-4 MiB of streamed bytes / grid step


# ----------------------------------------------------------------------------
# tiling helpers
# ----------------------------------------------------------------------------
def _round_up(x, m):
    return ((x + m - 1) // m) * m


def _pick_rb(n, row_bytes, fixed_bytes=0, cap=8192):
    """Row block: power-of-two multiple of 128, per-step streamed bytes near the
    2-4 MiB target, double-buffered working set within the VMEM tile budget,
    limited padding waste, and >=2 grid steps when the row count allows
    (so "parallel" can shard across v7x's two TensorCores)."""
    pn_min = _round_up(max(n, 1), 128)
    rb = 128
    while (rb * 2 <= min(cap, pn_min)
           and (rb * 2) * row_bytes <= TARGET_STEP_BYTES
           and 2 * (rb * 2) * row_bytes + fixed_bytes <= TILE_BUDGET):
        rb *= 2
    while rb > 128 and 2 * (_round_up(n, rb) - n) > rb:          # limit padding waste
        rb //= 2
    while rb > 128 and _round_up(n, rb) // rb < 2:               # >= 2 grid steps
        rb //= 2
    return rb


def _pad_rows_to(x, pn):
    n = x.shape[0]
    if pn == n:
        return x
    pad = [(0, pn - n)] + [(0, 0)] * (x.ndim - 1)
    return jnp.pad(x, pad)


def _pad_axis1(x, pn):
    n = x.shape[1]
    if pn == n:
        return x
    pad = [(0, 0), (0, pn - n)] + [(0, 0)] * (x.ndim - 2)
    return jnp.pad(x, pad)


def _wdt(w):
    return jnp.asarray(w, ACT_DT)


def _row(b):
    return jnp.asarray(b, jnp.float32).reshape(1, -1)


# ----------------------------------------------------------------------------
# Pallas kernels
# ----------------------------------------------------------------------------
def _linear_kernel(x_ref, w_ref, b_ref, *rest, relu, res_mode):
    """y = x @ W + b  (+res) (ReLU) (+res).  All BN / PDNorm affines are folded
    into W, b by the wrapper.  res_mode: 0 none, 1 add-before-ReLU, 2 add-after."""
    o_ref = rest[-1]
    res_ref = rest[0] if res_mode else None
    y = jnp.dot(x_ref[...], w_ref[...], preferred_element_type=jnp.float32)
    y = y + b_ref[...]
    if res_mode == 1:
        y = y + res_ref[...].astype(jnp.float32)
    if relu:
        y = jnp.maximum(y, 0.0)
    if res_mode == 2:
        y = y + res_ref[...].astype(jnp.float32)
    o_ref[...] = y.astype(o_ref.dtype)


@partial(jax.jit, static_argnames=("relu", "res_mode", "rb", "out_dtype"))
def _linear_call(xp, w, b2, res, relu, res_mode, rb, out_dtype):
    pn, cin = xp.shape
    cout = w.shape[1]
    # TODO(synk): pipeline_mode=pl.Buffered(1) on the constant (W, b) operands
    #             would halve their VMEM footprint; left at the default here.
    in_specs = [
        pl.BlockSpec((rb, cin), lambda i: (i, 0)),
        pl.BlockSpec((cin, cout), lambda i: (0, 0)),
        pl.BlockSpec((1, cout), lambda i: (0, 0)),
    ]
    args = [xp, w, b2]
    if res_mode:
        in_specs.append(pl.BlockSpec((rb, cout), lambda i: (i, 0)))
        args.append(res)
    return pl.pallas_call(
        partial(_linear_kernel, relu=relu, res_mode=res_mode),
        out_shape=jax.ShapeDtypeStruct((pn, cout), jnp.dtype(out_dtype)),
        grid_spec=pltpu.PrefetchScalarGridSpec(
            num_scalar_prefetch=0,
            grid=(pn // rb,),
            in_specs=in_specs,
            out_specs=pl.BlockSpec((rb, cout), lambda i: (i, 0)),
        ),
        compiler_params=pltpu.CompilerParams(
            dimension_semantics=("parallel",),
            vmem_limit_bytes=VMEM_LIMIT),
    )(*args)


def _mlp2_kernel(x_ref, w1_ref, b1_ref, w2_ref, b2_ref, o_ref, *, relu_cols):
    """y = relu(x @ W1 + b1) @ W2 + b2 ; optional ReLU on the first `relu_cols`
    output columns (fused fc1+norm1 -> concatenated q/k/v projection)."""
    h = jnp.dot(x_ref[...], w1_ref[...], preferred_element_type=jnp.float32)
    h = jnp.maximum(h + b1_ref[...], 0.0)
    y = jnp.dot(h.astype(w2_ref.dtype), w2_ref[...],
                preferred_element_type=jnp.float32) + b2_ref[...]
    cout = y.shape[1]
    if relu_cols >= cout:
        y = jnp.maximum(y, 0.0)
    elif relu_cols > 0:
        col = lax.broadcasted_iota(jnp.int32, y.shape, 1)
        y = jnp.where(col < relu_cols, jnp.maximum(y, 0.0), y)
    o_ref[...] = y.astype(o_ref.dtype)


@partial(jax.jit, static_argnames=("relu_cols", "rb"))
def _mlp2_call(xp, w1, b1, w2, b2, relu_cols, rb):
    pn, cin = xp.shape
    ch = w1.shape[1]
    cout = w2.shape[1]
    return pl.pallas_call(
        partial(_mlp2_kernel, relu_cols=relu_cols),
        out_shape=jax.ShapeDtypeStruct((pn, cout), ACT_DT),
        grid_spec=pltpu.PrefetchScalarGridSpec(
            num_scalar_prefetch=0,
            grid=(pn // rb,),
            in_specs=[
                pl.BlockSpec((rb, cin), lambda i: (i, 0)),
                pl.BlockSpec((cin, ch), lambda i: (0, 0)),
                pl.BlockSpec((1, ch), lambda i: (0, 0)),
                pl.BlockSpec((ch, cout), lambda i: (0, 0)),
                pl.BlockSpec((1, cout), lambda i: (0, 0)),
            ],
            out_specs=pl.BlockSpec((rb, cout), lambda i: (i, 0)),
        ),
        compiler_params=pltpu.CompilerParams(
            dimension_semantics=("parallel",),
            vmem_limit_bytes=VMEM_LIMIT),
    )(xp, w1, b1, w2, b2)


def _gva_block_kernel(x_ref, idn_ref,
                      wp1_ref, bp1_ref, wp2_ref, bp2_ref,
                      ww1_ref, bw1_ref, ww2_ref, bw2_ref,
                      a2_ref, b2_ref, w3_ref, b3_ref, o_ref, *, C):
    """Fused grouped-vector-attention block tail.

    x : (ns, rb, 2C+4) lane-dense pack per neighbour s: [k-q | v | pos | mask].
    The (static, unrolled) neighbour loop runs an online softmax over channels:
      peb = Linear(relu(Linear(pos)))          (PointBatchNorm folded in layer 1)
      wl  = Linear_exp(relu(Linear(k-q+peb)))  (group layer pre-expanded -> C)
      out = sum_s (v+peb)*mask*softmax_s(wl)   (mask applied POST-softmax)
    Epilogue: norm2(+ReLU), fc3+norm3 (folded), residual add, final ReLU.
    """
    ns = x_ref.shape[0]
    rb = x_ref.shape[1]
    m = jnp.full((rb, C), -jnp.inf, dtype=jnp.float32)
    den = jnp.zeros((rb, C), dtype=jnp.float32)
    num = jnp.zeros((rb, C), dtype=jnp.float32)

    for s in range(ns):                                   # static, unrolled
        xs = x_ref[s]                                     # (rb, 2C+4)
        kq_s = xs[:, :C].astype(jnp.float32)
        v_s = xs[:, C:2 * C].astype(jnp.float32)
        pos_s = xs[:, 2 * C:2 * C + 3]
        msk_s = xs[:, 2 * C + 3:2 * C + 4].astype(jnp.float32)   # (rb, 1)

        h = jnp.dot(pos_s, wp1_ref[...], preferred_element_type=jnp.float32)
        h = jnp.maximum(h + bp1_ref[...], 0.0)
        peb = jnp.dot(h.astype(wp2_ref.dtype), wp2_ref[...],
                      preferred_element_type=jnp.float32) + bp2_ref[...]

        rel = (kq_s + peb).astype(ww1_ref.dtype)
        h2 = jnp.dot(rel, ww1_ref[...], preferred_element_type=jnp.float32)
        h2 = jnp.maximum(h2 + bw1_ref[...], 0.0)
        wl = jnp.dot(h2.astype(ww2_ref.dtype), ww2_ref[...],
                     preferred_element_type=jnp.float32) + bw2_ref[...]

        val = (v_s + peb) * msk_s                          # post-softmax mask
        m_new = jnp.maximum(m, wl)
        scale = jnp.exp(m - m_new)
        e = jnp.exp(wl - m_new)
        den = den * scale + e
        num = num * scale + val * e
        m = m_new

    out = num / den                                        # (rb, C)
    out = jnp.maximum(out * a2_ref[...] + b2_ref[...], 0.0)     # norm2 + ReLU
    y = jnp.dot(out.astype(w3_ref.dtype), w3_ref[...],
                preferred_element_type=jnp.float32) + b3_ref[...]   # fc3 + norm3
    y = jnp.maximum(y + idn_ref[...].astype(jnp.float32), 0.0)     # residual + ReLU
    o_ref[...] = y.astype(o_ref.dtype)


@partial(jax.jit, static_argnames=("C", "rb"))
def _gva_block_call(x, idn, wp1, bp1, wp2, bp2, ww1, bw1, ww2, bw2,
                    a2, b2, w3, b3, *, C, rb):
    ns, pn, X = x.shape
    g = ww1.shape[1]
    const = lambda i: (0, 0)
    return pl.pallas_call(
        partial(_gva_block_kernel, C=C),
        out_shape=jax.ShapeDtypeStruct((pn, C), ACT_DT),
        grid_spec=pltpu.PrefetchScalarGridSpec(
            num_scalar_prefetch=0,
            grid=(pn // rb,),
            in_specs=[
                pl.BlockSpec((ns, rb, X), lambda i: (0, i, 0)),
                pl.BlockSpec((rb, C), lambda i: (i, 0)),
                pl.BlockSpec((3, C), const),
                pl.BlockSpec((1, C), const),
                pl.BlockSpec((C, C), const),
                pl.BlockSpec((1, C), const),
                pl.BlockSpec((C, g), const),
                pl.BlockSpec((1, g), const),
                pl.BlockSpec((g, C), const),
                pl.BlockSpec((1, C), const),
                pl.BlockSpec((1, C), const),
                pl.BlockSpec((1, C), const),
                pl.BlockSpec((C, C), const),
                pl.BlockSpec((1, C), const),
            ],
            out_specs=pl.BlockSpec((rb, C), lambda i: (i, 0)),
        ),
        compiler_params=pltpu.CompilerParams(
            dimension_semantics=("parallel",),
            vmem_limit_bytes=VMEM_LIMIT),
    )(x, idn, wp1, bp1, wp2, bp2, ww1, bw1, ww2, bw2, a2, b2, w3, b3)


# ----------------------------------------------------------------------------
# Thin wrappers (padding, row-block selection, weight folding)
# ----------------------------------------------------------------------------
def fold_affine(w, b, a=None, shift=None):
    """Return W', b' so that (x @ W + b) * a + shift == x @ W' + b'."""
    w = jnp.asarray(w, jnp.float32)
    cout = w.shape[1]
    b = jnp.zeros((cout,), jnp.float32) if b is None else jnp.asarray(b, jnp.float32)
    if a is not None:
        w = w * a
        b = b * a
    if shift is not None:
        b = b + shift
    return w, b


def pdnorm_affine(p_norm, context):
    """PDBatchNorm (decoupled, affine=False, adaptive=True), eval mode, hoisted.
    Returns per-channel (a, b) so that pdnorm(x) == x * a + b."""
    c = jnp.asarray(context, jnp.float32)
    c = c * jax.nn.sigmoid(c)                              # SiLU
    mod = c @ jnp.asarray(p_norm['mod']['w'], jnp.float32) + p_norm['mod']['b']
    C = mod.shape[1] // 2
    shift = mod[0, :C]
    scale = mod[0, C:]
    return PDBN_SCALE * (1.0 + scale), shift


def linear_fused(x, w, b=None, relu=False, residual=None, res_after_act=False,
                 out_dtype=ACT_DT):
    n, cin = x.shape
    w = jnp.asarray(w, jnp.float32)
    cout = w.shape[1]
    b = jnp.zeros((cout,), jnp.float32) if b is None else jnp.asarray(b, jnp.float32)
    res_mode = 0 if residual is None else (2 if res_after_act else 1)
    row_bytes = 2 * (cin + cout + (cout if res_mode else 0)) + 4 * cout
    fixed = 2 * (2 * cin * cout + 4 * cout)
    rb = _pick_rb(n, row_bytes, fixed)
    pn = _round_up(n, rb)
    xp = _pad_rows_to(jnp.asarray(x, ACT_DT), pn)
    resp = _pad_rows_to(jnp.asarray(residual, ACT_DT), pn) if res_mode else None
    out = _linear_call(xp, _wdt(w), _row(b), resp,
                       relu=relu, res_mode=res_mode, rb=rb,
                       out_dtype=jnp.dtype(out_dtype).name)
    return out[:n]


def mlp2_fused(x, w1, b1, w2, b2, relu_cols=0):
    n, cin = x.shape
    ch, cout = w1.shape[1], w2.shape[1]
    row_bytes = 2 * (cin + cout) + 4 * ch
    fixed = 2 * (2 * (cin * ch + ch * cout) + 4 * (ch + cout))
    rb = _pick_rb(n, row_bytes, fixed)
    pn = _round_up(n, rb)
    out = _mlp2_call(_pad_rows_to(jnp.asarray(x, ACT_DT), pn),
                     _wdt(w1), _row(b1), _wdt(w2), _row(b2),
                     relu_cols=relu_cols, rb=rb)
    return out[:n]


def gva_block_fused(x, identity, wp1, bp1, wp2, bp2, ww1, bw1, ww2, bw2,
                    a2, b2, w3, b3, C):
    ns, n, X = x.shape
    g = ww1.shape[1]
    row_bytes = 2 * (ns * X + 2 * C) + 64 * C        # streamed + f32 accumulators
    fixed = 2 * (3 * C + 2 * C * C + 2 * C * g) + 4 * (7 * C + g)
    rb = _pick_rb(n, row_bytes, fixed, cap=4096)
    pn = _round_up(n, rb)
    out = _gva_block_call(
        _pad_axis1(x, pn), _pad_rows_to(jnp.asarray(identity, ACT_DT), pn),
        _wdt(wp1), _row(bp1), _wdt(wp2), _row(bp2),
        _wdt(ww1), _row(bw1), _wdt(ww2), _row(bw2),
        _row(a2), _row(b2), _wdt(w3), _row(b3),
        C=C, rb=rb)
    return out[:n]


# ----------------------------------------------------------------------------
# Irregular glue (kNN, grouping, voxel pooling) — plain JAX / numpy
# ----------------------------------------------------------------------------
def offset2batch(offset):
    off = np.asarray(offset)
    counts = np.diff(np.concatenate([[0], off]))
    return jnp.asarray(np.repeat(np.arange(off.shape[0]), counts), dtype=jnp.int32)


def knn_query(k, coord, batch):
    # TODO(synk): pointops.knn_query is a spatial-index kNN; dense distance
    #             matrix + top_k is used instead (same result for small N).
    d2 = jnp.sum((coord[:, None, :] - coord[None, :, :]) ** 2, axis=-1)
    same = batch[:, None] == batch[None, :]
    d2 = jnp.where(same, d2, jnp.inf)
    neg, idx = lax.top_k(-d2, k)
    idx = jnp.where(jnp.isinf(neg), -1, idx)       # cross-batch picks -> invalid
    return idx.astype(jnp.int32)


# ----------------------------------------------------------------------------
# Model blocks
# ----------------------------------------------------------------------------
def grouped_vector_attention_block(p, q, k, v, coord, reference_index,
                                   a2, b2, w3, b3, identity):
    C, g = p['C'], p['groups']
    i_per_g = C // g

    idx_t = reference_index.T                      # (ns, n) neighbour-major
    valid = idx_t >= 0
    safe = jnp.where(valid, idx_t, 0)
    # TODO(synk): pointops.grouping stays as an XLA gather; an in-kernel
    #             scalar-prefetched gather would remove this HBM round trip too.
    k_g = jnp.where(valid[..., None], jnp.take(k, safe, axis=0), 0)
    v_g = jnp.where(valid[..., None], jnp.take(v, safe, axis=0), 0)
    pos = jnp.where(valid[..., None],
                    jnp.take(coord, safe, axis=0) - coord[None, :, :], 0.0)

    kq = (k_g - q[None, :, :]).astype(ACT_DT)
    # single lane-dense (ns, n, 2C+4) operand: [k-q | v | pos | mask]
    x = jnp.concatenate(
        [kq, v_g.astype(ACT_DT), pos.astype(ACT_DT),
         valid.astype(ACT_DT)[..., None]], axis=-1)

    # pe_bias branch (pe_multiplier=False, pe_bias=True) + weight encoding with
    # PointBatchNorm folded and the group-level layer expanded to channels.
    wp1, bp1 = fold_affine(p['pb1']['w'], p['pb1']['b'], PBN_SCALE)
    ww1, bw1 = fold_affine(p['we1']['w'], p['we1']['b'], PBN_SCALE)
    ww2 = jnp.repeat(jnp.asarray(p['we2']['w'], jnp.float32), i_per_g, axis=1)  # (g, C)
    bw2 = jnp.repeat(jnp.asarray(p['we2']['b'], jnp.float32), i_per_g)          # (C,)

    return gva_block_fused(x, identity, wp1, bp1, p['pb2']['w'], p['pb2']['b'],
                           ww1, bw1, ww2, bw2, a2, b2, w3, b3, C)


def block_forward(p, points, ref_idx):
    coord, feat, offset, cond, ctx = points
    identity = feat
    attn = p['attn']
    C = attn['C']

    # fc1 (bias=False) + norm1 + ReLU fused with the concatenated q/k/v proj
    # (PointBatchNorm folded into q/k; ReLU applied only to the q/k columns).
    a1, b1 = pdnorm_affine(p['norm1'], ctx)
    w_fc1, b_fc1 = fold_affine(p['fc1']['w'], None, a1, b1)
    wq, bq = fold_affine(attn['q']['w'], attn['q']['b'], PBN_SCALE)
    wk, bk = fold_affine(attn['k']['w'], attn['k']['b'], PBN_SCALE)
    wv = jnp.asarray(attn['v']['w'], jnp.float32)
    bv = jnp.asarray(attn['v']['b'], jnp.float32)
    w_qkv = jnp.concatenate([wq, wk, wv], axis=1)
    b_qkv = jnp.concatenate([bq, bk, bv])
    qkv = mlp2_fused(feat, w_fc1, b_fc1, w_qkv, b_qkv, relu_cols=2 * C)
    q, k, v = qkv[:, :C], qkv[:, C:2 * C], qkv[:, 2 * C:]

    # attention + norm2 + ReLU + fc3 + norm3 + residual + ReLU: one kernel
    a2, b2 = pdnorm_affine(p['norm2'], ctx)
    a3, b3 = pdnorm_affine(p['norm3'], ctx)
    w_fc3, b_fc3 = fold_affine(p['fc3']['w'], None, a3, b3)
    feat = grouped_vector_attention_block(attn, q, k, v, coord, ref_idx,
                                          a2, b2, w_fc3, b_fc3, identity)
    return [coord, feat, offset, cond, ctx]


def block_sequence(blocks_p, points, neighbours):
    coord, _, offset, _, _ = points
    batch = offset2batch(offset)
    ref_idx = knn_query(neighbours, coord, batch)
    for bp in blocks_p:
        points = block_forward(bp, points, ref_idx)
    return points


def grid_pool(p, points, grid_size):
    coord, feat, offset, cond, ctx = points
    batch = offset2batch(offset)
    a, b = pdnorm_affine(p['norm'], ctx)
    w, bb = fold_affine(p['fc']['w'], None, a, b)
    h = linear_fused(feat, w, bb, relu=True)                # fc + norm + ReLU fused

    # TODO(synk): voxel_grid / torch.unique / segment_csr are data-dependent
    #             scatter ops (dynamic output shapes); kept in numpy/JAX glue.
    coord_np = np.asarray(coord)
    batch_np = np.asarray(batch)
    nb = int(batch_np.max()) + 1
    start = np.stack([coord_np[batch_np == bidx].min(axis=0) for bidx in range(nb)], axis=0)
    gc = np.floor((coord_np - start[batch_np]) / grid_size).astype(np.int64)
    span = int(gc.max()) + 1 if gc.size else 1
    key = ((batch_np.astype(np.int64) * span + gc[:, 0]) * span + gc[:, 1]) * span + gc[:, 2]
    uniq, cluster_np, counts_np = np.unique(key, return_inverse=True, return_counts=True)
    m = uniq.shape[0]
    cluster = jnp.asarray(cluster_np.astype(np.int32))
    counts = jnp.asarray(counts_np.astype(np.float32))

    new_coord = jax.ops.segment_sum(coord, cluster, num_segments=m) / counts[:, None]
    new_feat = jax.ops.segment_max(h.astype(jnp.float32), cluster,
                                   num_segments=m).astype(ACT_DT)

    batch_of_cluster = np.zeros((m,), np.int64)
    batch_of_cluster[cluster_np] = batch_np
    new_offset = jnp.asarray(
        np.cumsum(np.bincount(batch_of_cluster, minlength=nb)).astype(np.int32))
    return [new_coord, new_feat, new_offset, cond, ctx], cluster


def unpool_with_skip(p, points, skip_points, cluster):
    coord, feat, offset, cond, ctx = points
    s_coord, s_feat, s_offset, _, _ = skip_points
    a_p, b_p = pdnorm_affine(p['proj_norm'], ctx)
    w_p, bb_p = fold_affine(p['proj']['w'], p['proj']['b'], a_p, b_p)
    h = linear_fused(feat, w_p, bb_p, relu=True)            # proj + norm + ReLU fused
    h = jnp.take(h, cluster, axis=0)                        # 'map' unpool backend
    a_s, b_s = pdnorm_affine(p['skip_norm'], ctx)
    w_s, bb_s = fold_affine(p['skip']['w'], p['skip']['b'], a_s, b_s)
    # skip + norm + ReLU fused, with the mapped features added post-activation
    out = linear_fused(s_feat, w_s, bb_s, relu=True, residual=h, res_after_act=True)
    return [s_coord, out, s_offset, cond, ctx]


def forward(params, cfg, coord, feat, offset, condition, context):
    assert condition in cfg['conditions']

    # GVAPatchEmbed: proj (bias=False) + PDNorm + ReLU fused into one kernel
    pe = params['patch_embed']
    a, b = pdnorm_affine(pe['norm'], context)
    w, bb = fold_affine(pe['proj']['w'], None, a, b)
    h = linear_fused(jnp.asarray(feat, jnp.float32), w, bb, relu=True)
    points = [coord, h, offset, condition, context]
    points = block_sequence(pe['blocks'], points, cfg['patch_embed_neighbours'])

    skips = [[points]]
    for i in range(cfg['num_stages']):
        p_enc = params['enc'][i]
        pts, cluster = grid_pool(p_enc['down'], points, cfg['grid_sizes'][i])
        points = block_sequence(p_enc['blocks'], pts, cfg['enc_neighbours'][i])
        skips[-1].append(cluster)
        skips.append([points])

    points = skips.pop(-1)[0]
    for i in reversed(range(cfg['num_stages'])):
        skip_points, cluster = skips.pop(-1)
        p_dec = params['dec'][i]
        points = unpool_with_skip(p_dec, points, skip_points, cluster)
        points = block_sequence(p_dec['blocks'], points, cfg['dec_neighbours'][i])

    feat_out = points[1]
    return linear_fused(feat_out, params['seg_head']['w'], params['seg_head']['b'],
                        out_dtype=jnp.float32)


# ----------------------------------------------------------------------------
# Deterministic parameter construction
# ----------------------------------------------------------------------------
class Rng:
    def __init__(self, key):
        self.key = key

    def next(self):
        self.key, sub = jax.random.split(self.key)
        return sub


def linear_params(rng, cin, cout, bias=True):
    k = 1.0 / math.sqrt(cin)
    w = jax.random.uniform(rng.next(), (cin, cout), minval=-k, maxval=k, dtype=jnp.float32)
    b = (jax.random.uniform(rng.next(), (cout,), minval=-k, maxval=k, dtype=jnp.float32)
         if bias else None)
    return {'w': w, 'b': b}


def build_params(rng, cfg):
    cc = cfg['context_channels']

    def pdnorm(C):
        return dict(mod=linear_params(rng, cc, 2 * C, True))

    def gva(C, g):
        return dict(C=C, groups=g,
                    q=linear_params(rng, C, C, True),
                    k=linear_params(rng, C, C, True),
                    v=linear_params(rng, C, C, True),
                    pb1=linear_params(rng, 3, C, True),
                    pb2=linear_params(rng, C, C, True),
                    we1=linear_params(rng, C, g, True),
                    we2=linear_params(rng, g, g, True))

    def block(C, g):
        return dict(fc1=linear_params(rng, C, C, False),
                    fc3=linear_params(rng, C, C, False),
                    norm1=pdnorm(C), norm2=pdnorm(C), norm3=pdnorm(C),
                    attn=gva(C, g))

    params = {}
    pe_c = cfg['patch_embed_channels']
    params['patch_embed'] = dict(
        proj=linear_params(rng, cfg['in_channels'], pe_c, False),
        norm=pdnorm(pe_c),
        blocks=[block(pe_c, cfg['patch_embed_groups'])
                for _ in range(cfg['patch_embed_depth'])])

    enc_ch = [pe_c] + list(cfg['enc_channels'])
    dec_ch = list(cfg['dec_channels']) + [enc_ch[-1]]
    params['enc'], params['dec'] = [], []
    for i in range(cfg['num_stages']):
        params['enc'].append(dict(
            down=dict(fc=linear_params(rng, enc_ch[i], enc_ch[i + 1], False),
                      norm=pdnorm(enc_ch[i + 1])),
            blocks=[block(enc_ch[i + 1], cfg['enc_groups'][i])
                    for _ in range(cfg['enc_depths'][i])]))
        params['dec'].append(dict(
            proj=linear_params(rng, dec_ch[i + 1], dec_ch[i], True),
            proj_norm=pdnorm(dec_ch[i]),
            skip=linear_params(rng, enc_ch[i], dec_ch[i], True),
            skip_norm=pdnorm(dec_ch[i]),
            blocks=[block(dec_ch[i], cfg['dec_groups'][i])
                    for _ in range(cfg['dec_depths'][i])]))
    params['seg_head'] = linear_params(rng, dec_ch[0], cfg['num_classes'], True)
    return params


# ----------------------------------------------------------------------------
if __name__ == "__main__":
    cfg = dict(
        in_channels=6, num_classes=4,
        patch_embed_depth=1, patch_embed_channels=8,
        patch_embed_groups=2, patch_embed_neighbours=4,
        enc_depths=(1, 1), enc_channels=(16, 32), enc_groups=(4, 8), enc_neighbours=(4, 4),
        dec_depths=(1, 1), dec_channels=(8, 16), dec_groups=(2, 4), dec_neighbours=(4, 4),
        grid_sizes=(0.12, 0.24),
        context_channels=16,
        conditions=("ScanNet", "S3DIS", "Structured3D"),
    )
    cfg['num_stages'] = len(cfg['enc_depths'])

    root = jax.random.PRNGKey(0)
    k_param, k_coord, k_feat, k_ctx = jax.random.split(root, 4)
    params = build_params(Rng(k_param), cfg)

    n_per_batch = 48
    n = 2 * n_per_batch
    coord = jax.random.uniform(k_coord, (n, 3), dtype=jnp.float32)
    feat = jax.random.normal(k_feat, (n, cfg['in_channels']), dtype=jnp.float32)
    offset = jnp.array([n_per_batch, n], dtype=jnp.int32)
    context = jax.random.normal(k_ctx, (1, cfg['context_channels']), dtype=jnp.float32)
    condition = "ScanNet"

    logits = forward(params, cfg, coord, feat, offset, condition, context)
    logits = jax.block_until_ready(logits)
    assert logits.shape == (n, cfg['num_classes'])
    assert bool(jnp.all(jnp.isfinite(logits)))
    print("KERNEL_OK")
</pallas_src>

<mosaic_0001>
module attributes {stable_mosaic.version = 11 : i64} {
  func.func @_linear_kernel(%arg0: i32, %arg1: memref<128x6xbf16, #tpu.memory_space<vmem>>, %arg2: memref<6x8xbf16, #tpu.memory_space<vmem>>, %arg3: memref<1x8xf32, #tpu.memory_space<vmem>>, %arg4: memref<128x8xbf16, #tpu.memory_space<vmem>>) attributes {dimension_semantics = [#tpu.dimension_semantics<parallel>], iteration_bounds = array<i64: 1>, scalar_prefetch = 0 : i64, scratch_operands = 0 : i64, tpu.core_type = #tpu.core_type<tc>, window_params = [{transform_indices = @transform_0, window_bounds = array<i64: 128, 6>}, {pipeline_mode = #tpu.pipeline_mode<synchronous>, transform_indices = @transform_1, window_bounds = array<i64: 6, 8>}, {pipeline_mode = #tpu.pipeline_mode<synchronous>, transform_indices = @transform_2, window_bounds = array<i64: 1, 8>}, {transform_indices = @transform_3, window_bounds = array<i64: 128, 8>}]} {
    %c0 = arith.constant 0 : index
    %c0_0 = arith.constant 0 : index
    %0 = vector.load %arg1[%c0, %c0_0] : memref<128x6xbf16, #tpu.memory_space<vmem>>, vector<128x6xbf16>
    %c0_1 = arith.constant 0 : index
    %c0_2 = arith.constant 0 : index
    %1 = vector.load %arg2[%c0_1, %c0_2] : memref<6x8xbf16, #tpu.memory_space<vmem>>, vector<6x8xbf16>
    %cst = arith.constant dense<0.000000e+00> : vector<128x8xf32>
    %2 = tpu.matmul %0, %1, %cst {dimension_numbers = #tpu.dot_dimension_numbers<[1], [0], [0], [1], [0, 0, 1, 1], [], []>} : vector<128x6xbf16>, vector<6x8xbf16>, vector<128x8xf32> -> vector<128x8xf32>
    %c0_3 = arith.constant 0 : index
    %c0_4 = arith.constant 0 : index
    %3 = vector.load %arg3[%c0_3, %c0_4] : memref<1x8xf32, #tpu.memory_space<vmem>>, vector<1x8xf32>
    %4 = vector.broadcast %3 : vector<1x8xf32> to vector<128x8xf32>
    %5 = arith.addf %2, %4 : vector<128x8xf32>
    %cst_5 = arith.constant 0.000000e+00 : f32
    %6 = vector.broadcast %cst_5 : f32 to vector<128x8xf32>
    %7 = arith.maximumf %5, %6 : vector<128x8xf32>
    %8 = arith.truncf %7 : vector<128x8xf32> to vector<128x8xbf16>
    %c0_6 = arith.constant 0 : index
    %c0_7 = arith.constant 0 : index
    %9 = vector.load %arg4[%c0_6, %c0_7] : memref<128x8xbf16, #tpu.memory_space<vmem>>, vector<128x8xbf16>
    tpu.vector_store %arg4[%c0_6, %c0_7], %8 {strides = array<i32>} : memref<128x8xbf16, #tpu.memory_space<vmem>>, vector<128x8xbf16>,
    return
  }
  func.func @transform_0(%arg0: i32) -> (i32, i32) {
    %c0_i32 = arith.constant 0 : i32
    %c0_i32_0 = arith.constant 0 : i32
    return %arg0, %c0_i32 : i32, i32
  }
  func.func @transform_1(%arg0: i32) -> (i32, i32) {
    %c0_i32 = arith.constant 0 : i32
    %c0_i32_0 = arith.constant 0 : i32
    %c0_i32_1 = arith.constant 0 : i32
    return %c0_i32, %c0_i32_0 : i32, i32
  }
  func.func @transform_2(%arg0: i32) -> (i32, i32) {
    %c0_i32 = arith.constant 0 : i32
    %c0_i32_0 = arith.constant 0 : i32
    %c0_i32_1 = arith.constant 0 : i32
    return %c0_i32, %c0_i32_0 : i32, i32
  }
  func.func @transform_3(%arg0: i32) -> (i32, i32) {
    %c0_i32 = arith.constant 0 : i32
    %c0_i32_0 = arith.constant 0 : i32
    return %arg0, %c0_i32 : i32, i32
  }
}

</mosaic_0001>

<bundles_post_ra>
// kernel: _linear_call.1
= control target key start
LH: loop header
LB: loop body
LE: loop exit
PB: predicated region body
PF: predicated region fallthrough
CT: control target
= control target key end

     0   :  { %vm101_vm0 = vcmask 1042432   ;;  %vm76_vm1 = vcmask 48128   ;;  %vm186_vm2 = vcmask 60416   ;;  %s399_s1 = inlined_call_operand.vmem [shape: bf16[6,8], index: 1, kind: input, shape index: {}]   ;;  %s400_s0 = inlined_call_operand.vmem [shape: bf16[128,6], index: 0, kind: input, shape index: {}]   ;;  %s401_s2 = inlined_call_operand.vmem [shape: f32[1,8], index: 2, kind: input, shape index: {}]   ;;  %s402_s3 = inlined_call_operand.vmem [shape: bf16[128,8], index: 3, kind: output, shape index: {}]  }
   0x1   :  { %v31_v0 = vld [vmem:[%s399_s1] sm:$0x7]  ;;  %v249_v3 = vld [vmem:[%s400_s0 + $0x10] sm:$0xff]  ;;  %v248_v6 = vld [vmem:[%s400_s0 + $0x8] sm:$0xff] }
   0x2   :  { %v103_v1 = vsel %vm101_vm0, %v31_v0, 0  ;;  %v247_v2 = vld [vmem:[%s400_s0] sm:$0xff]  ;;  %v253_v5 = vld [vmem:[%s400_s0 + $0x30] sm:$0xff]  ;;  %v250_v7 = vld [vmem:[%s400_s0 + $0x18] sm:$0xff] }
   0x3   :  { %112 = vmatpush.bf16.msra.mxu0 %v103_v1  ;;  %255 = vmatpush.bf16.msra.mxu1 %v103_v1  ;;  %v251_v4 = vld [vmem:[%s400_s0 + $0x20] sm:$0xff]  ;;  %v252_v8 = vld [vmem:[%s400_s0 + $0x28] sm:$0xff]  ;;  %v254_v9 = vld [vmem:[%s400_s0 + $0x38] sm:$0xff] }
   0x4   :  { %256 = vmatpush.bf16.msra.mxu2 %v103_v1  ;;  %257 = vmatpush.bf16.msra.mxu3 %v103_v1  ;;  %v317_v10 = vld [vmem:[%s401_s2] ss:$0 sm:$0xff] }
   0x6   :  { %239 = vmatmul.msk.bf16.vlgmr.msra.gmra.mxu0 %vm76_vm1, %v247_v2  ;;  %241 = vmatmul.msk.bf16.vlgmr.msra.gmra.mxu1 %vm76_vm1, %v249_v3 }
   0x7   :  { %243 = vmatmul.msk.bf16.vlgmr.msra.gmra.mxu2 %vm76_vm1, %v251_v4  ;;  %245 = vmatmul.msk.bf16.vlgmr.msra.gmra.mxu3 %vm76_vm1, %v253_v5 }
  0x16   :  { %240 = vmatmul.msk.bf16.gmra.mxu0 %vm76_vm1, %v248_v6  ;;  %242 = vmatmul.msk.bf16.gmra.mxu1 %vm76_vm1, %v250_v7 }
  0x17   :  { %244 = vmatmul.msk.bf16.gmra.mxu2 %vm76_vm1, %v252_v8  ;;  %246 = vmatmul.msk.bf16.gmra.mxu3 %vm76_vm1, %v254_v9 }
  0x83   :  { %v114_v11 = vpop.f32.mrf.mxu0  ;;  %v124_v12 = vpop.f32.mrf.mxu1 }
  0x84   :  { %v115_v13 = vadd.f32 %v317_v10, %v114_v11  ;;  %v125_v14 = vadd.f32 %v317_v10, %v124_v12 }
  0x86   :  { %v154_v15 = vmax.f32 %v115_v13, 0.0  ;;  %v158_v16 = vmax.f32 %v125_v14, 0.0 }
  0x88   :  { %v170_v17 = vpack.c.bf16 %v154_v15, %v154_v15  ;;  %v174_v18 = vpack.c.bf16 %v158_v16, %v158_v16 }
  0x8a   :  { %187 = vst.msk [vmem:[%s402_s3] sm:$0xf] %vm186_vm2, %v170_v17  ;;  %v134_v19 = vpop.f32.mrf.mxu2  ;;  %v144_v20 = vpop.f32.mrf.mxu3 }
  0x8b   :  { %191 = vst.msk [vmem:[%s402_s3 + $0x10] sm:$0xf] %vm186_vm2, %v174_v18  ;;  %v135_v21 = vadd.f32 %v317_v10, %v134_v19  ;;  %v145_v22 = vadd.f32 %v317_v10, %v144_v20  ;;  %v116_v23 = vpop.f32.mrf.mxu0  ;;  %v126_v24 = vpop.f32.mrf.mxu1 }
  0x8c   :  { %v117_v25 = vadd.f32 %v317_v10, %v116_v23  ;;  %v127_v26 = vadd.f32 %v317_v10, %v126_v24 }
  0x8d   :  { %v162_v27 = vmax.f32 %v135_v21, 0.0  ;;  %v166_v28 = vmax.f32 %v145_v22, 0.0 }
  0x8e   :  { %v155_v29 = vmax.f32 %v117_v25, 0.0  ;;  %v159_v30 = vmax.f32 %v127_v26, 0.0 }
  0x8f   :  { %v178_v31 = vpack.c.bf16 %v162_v27, %v162_v27  ;;  %v182_v32 = vpack.c.bf16 %v166_v28, %v166_v28 }
  0x90   :  { %v171_v33 = vpack.c.bf16 %v155_v29, %v155_v29  ;;  %v175_v34 = vpack.c.bf16 %v159_v30, %v159_v30 }
  0x91   :  { %195 = vst.msk [vmem:[%s402_s3 + $0x20] sm:$0xf] %vm186_vm2, %v178_v31 }
  0x92   :  { %199 = vst.msk [vmem:[%s402_s3 + $0x30] sm:$0xf] %vm186_vm2, %v182_v32  ;;  %v136_v35 = vpop.f32.mrf.mxu2  ;;  %v146_v36 = vpop.f32.mrf.mxu3 }
  0x93   :  { %188 = vst.msk [vmem:[%s402_s3 + $0x4] sm:$0xf] %vm186_vm2, %v171_v33  ;;  %v137_v37 = vadd.f32 %v317_v10, %v136_v35  ;;  %v147_v38 = vadd.f32 %v317_v10, %v146_v36  ;;  %v119_v39 = vpop.f32.mrf.mxu0  ;;  %v129_v40 = vpop.f32.mrf.mxu1 }
  0x94   :  { %192 = vst.msk [vmem:[%s402_s3 + $0x14] sm:$0xf] %vm186_vm2, %v175_v34  ;;  %v120_v41 = vadd.f32 %v317_v10, %v119_v39  ;;  %v130_v42 = vadd.f32 %v317_v10, %v129_v40 }
  0x95   :  { %v163_v43 = vmax.f32 %v137_v37, 0.0  ;;  %v167_v44 = vmax.f32 %v147_v38, 0.0 }
  0x96   :  { %v156_v45 = vmax.f32 %v120_v41, 0.0  ;;  %v160_v46 = vmax.f32 %v130_v42, 0.0 }
  0x97   :  { %v179_v47 = vpack.c.bf16 %v163_v43, %v163_v43  ;;  %v183_v48 = vpack.c.bf16 %v167_v44, %v167_v44 }
  0x98   :  { %v172_v49 = vpack.c.bf16 %v156_v45, %v156_v45  ;;  %v176_v50 = vpack.c.bf16 %v160_v46, %v160_v46 }
  0x99   :  { %196 = vst.msk [vmem:[%s402_s3 + $0x24] sm:$0xf] %vm186_vm2, %v179_v47 }
  0x9a   :  { %200 = vst.msk [vmem:[%s402_s3 + $0x34] sm:$0xf] %vm186_vm2, %v183_v48  ;;  %v139_v51 = vpop.f32.mrf.mxu2  ;;  %v149_v52 = vpop.f32.mrf.mxu3 }
  0x9b   :  { %189 = vst.msk [vmem:[%s402_s3 + $0x8] sm:$0xf] %vm186_vm2, %v172_v49  ;;  %v140_v53 = vadd.f32 %v317_v10, %v139_v51  ;;  %v150_v54 = vadd.f32 %v317_v10, %v149_v52  ;;  %v121_v55 = vpop.f32.mrf.mxu0  ;;  %v131_v56 = vpop.f32.mrf.mxu1 }
  0x9c   :  { %193 = vst.msk [vmem:[%s402_s3 + $0x18] sm:$0xf] %vm186_vm2, %v176_v50  ;;  %v122_v57 = vadd.f32 %v317_v10, %v121_v55  ;;  %v132_v58 = vadd.f32 %v317_v10, %v131_v56 }
  0x9d   :  { %v164_v59 = vmax.f32 %v140_v53, 0.0  ;;  %v168_v60 = vmax.f32 %v150_v54, 0.0 }
  0x9e   :  { %v157_v61 = vmax.f32 %v122_v57, 0.0  ;;  %v161_v62 = vmax.f32 %v132_v58, 0.0 }
  0x9f   :  { %v180_v63 = vpack.c.bf16 %v164_v59, %v164_v59  ;;  %v184_v0 = vpack.c.bf16 %v168_v60, %v168_v60 }
  0xa0   :  { %v173_v1 = vpack.c.bf16 %v157_v61, %v157_v61  ;;  %v177_v2 = vpack.c.bf16 %v161_v62, %v161_v62 }
  0xa1   :  { %197 = vst.msk [vmem:[%s402_s3 + $0x28] sm:$0xf] %vm186_vm2, %v180_v63 }
  0xa2   :  { %201 = vst.msk [vmem:[%s402_s3 + $0x38] sm:$0xf] %vm186_vm2, %v184_v0  ;;  %v141_v3 = vpop.f32.mrf.mxu2  ;;  %v151_v4 = vpop.f32.mrf.mxu3 }
  0xa3   :  { %190 = vst.msk [vmem:[%s402_s3 + $0xc] sm:$0xf] %vm186_vm2, %v173_v1  ;;  %v142_v5 = vadd.f32 %v317_v10, %v141_v3  ;;  %v152_v6 = vadd.f32 %v317_v10, %v151_v4 }
  0xa4   :  { %194 = vst.msk [vmem:[%s402_s3 + $0x1c] sm:$0xf] %vm186_vm2, %v177_v2 }
  0xa5   :  { %v165_v7 = vmax.f32 %v142_v5, 0.0  ;;  %v169_v8 = vmax.f32 %v152_v6, 0.0 }
  0xa7   :  { %v181_v9 = vpack.c.bf16 %v165_v7, %v165_v7  ;;  %v185_v11 = vpack.c.bf16 %v169_v8, %v169_v8 }
  0xa9   :  { %198 = vst.msk [vmem:[%s402_s3 + $0x2c] sm:$0xf] %vm186_vm2, %v181_v9 }
  0xaa   :  { %202 = vst.msk [vmem:[%s402_s3 + $0x3c] sm:$0xf] %vm186_vm2, %v185_v11 }

</bundles_post_ra>
